<compile_context>
chip_gen: v6e
topology: v6e:2x2x1
jax: 0.10.0
libtpu: 0.0.40
codegen_flags: <defaults>
</compile_context>

<pallas_src>
import jax
import jax.numpy as jnp
from jax.experimental import pallas as pl
from jax.experimental.pallas import tpu as pltpu

MIB = 1 << 20


def _round_up(n, m):
    return ((n + m - 1) // m) * m


def _pad_to(a, shape):
    return jnp.pad(a, [(0, t - s) for s, t in zip(a.shape, shape)])


def _mxu_align():
    # v6e/v7x MXUs are 256x256 -> prefer 256-aligned K/N; v5e (128x128) and unknown -> 128.
    try:
        kind = jax.devices()[0].device_kind.lower()
    except Exception:
        return 128
    return 256 if ("v6" in kind or "v7" in kind) else 128


# ----------------------------------------------------------------------------- kernel
def adversary_wrapper_kernel(x_ref, w1_ref, b1_ref, w2_ref, b2_ref, o_ref):
    # ---- module: Linear (bf16 MXU, f32 accumulate) + bias + ReLU (f32 VPU) ----
    x = x_ref[...].astype(jnp.bfloat16)                      # in-kernel cast, hidden under MXU
    h = jnp.dot(x, w1_ref[...], preferred_element_type=jnp.float32)   # [TILE_B, HID_P]
    h = jnp.maximum(h + b1_ref[...], 0.0)
    # ---- adversary: Linear (bf16 MXU, f32 accumulate) + bias + tanh (EUP) -----
    y = jnp.dot(h.astype(jnp.bfloat16), w2_ref[...],
                preferred_element_type=jnp.float32)                   # [TILE_B, OUT]
    o_ref[...] = jnp.tanh(y + b2_ref[...]).astype(o_ref.dtype)


# --------------------------------------------------------------- one-time param prep
def prepare_params(w1, b1, w2, b2, *, mxu_align=None):
    """One-time weight preprocessing (hoisted out of the per-call forward).

    Zero-padding of the hidden dim is exact: padded hidden cols get relu(0+0)=0 and
    then multiply zero rows of W2."""
    IN, HID = w1.shape
    OUT = w2.shape[1]
    if mxu_align is None:
        mxu_align = _mxu_align()
    HID_P = _round_up(HID, mxu_align)      # N of matmul-1 / K of matmul-2
    w1_p = _pad_to(w1, (IN, HID_P)).astype(jnp.bfloat16)
    b1_p = _pad_to(jnp.reshape(b1, (1, HID)), (1, HID_P)).astype(jnp.float32)
    w2_p = _pad_to(w2, (HID_P, OUT)).astype(jnp.bfloat16)
    b2_p = jnp.reshape(b2, (1, OUT)).astype(jnp.float32)
    return dict(w1=w1_p, b1=b1_p, w2=w2_p, b2=b2_p,
                IN=IN, HID=HID, OUT=OUT, HID_P=HID_P)


# ------------------------------------------------------------------------- forward
def adversary_wrapper_forward(x, params, *, tile_b=1024, out_dtype=jnp.bfloat16):
    B, IN = x.shape
    assert IN == params["IN"], "x feature dim must match the prepared weights"
    HID, HID_P, OUT = params["HID"], params["HID_P"], params["OUT"]
    w1_p, b1_p, w2_p, b2_p = params["w1"], params["b1"], params["w2"], params["b2"]

    x_isz = x.dtype.itemsize
    out_isz = jnp.dtype(out_dtype).itemsize

    # ---- batch tile: multiple of 128 (8 for tiny B), and >= 2 grid steps when B allows
    #      so the "parallel" axis shards across v7x's two TensorCores.
    tile_align = 128 if B >= 256 else 8
    two_step_cap = _round_up(max(-(-B // 2), 1), tile_align)
    TILE_B = max(8, min(_round_up(tile_b, tile_align), two_step_cap))

    param_bytes = (w1_p.size + w2_p.size) * 2 + (b1_p.size + b2_p.size) * 4

    def step_vmem(tb):
        # double-buffered x/out tiles + resident params (worst case: double-buffered
        # if the Buffered(1) request falls back) + f32 hidden intermediate.
        return (2 * tb * IN * x_isz + 2 * tb * OUT * out_isz
                + tb * HID_P * 4 + 2 * param_bytes)

    VMEM_BUDGET = 36 * MIB                   # conservative: fits v7x's 64 MiB with headroom
    while TILE_B > 8 and step_vmem(TILE_B) > VMEM_BUDGET:
        TILE_B = max(8, (TILE_B // 2) // 8 * 8)

    B_P = _round_up(B, TILE_B)
    x_p = x if B_P == B else jnp.pad(x, ((0, B_P - B), (0, 0)))   # padded rows sliced off below
    grid = (B_P // TILE_B,)

    # real footprint + 25% headroom, clamped to [32 MiB, 48 MiB] (never all of v7x's 64 MiB)
    vmem_limit = int(min(48 * MIB, max(32 * MIB, step_vmem(TILE_B) * 5 // 4)))

    # advisory cost estimate uses TRUE (unpadded) sizes
    cost = pl.CostEstimate(
        flops=2 * B * (IN * HID + HID * OUT),
        transcendentals=B * OUT,
        bytes_accessed=x.size * x_isz + param_bytes + B * OUT * out_isz,
    )

    def build(param_mode):
        def pspec(shape):
            if param_mode is None:
                return pl.BlockSpec(shape, lambda i: (0, 0))
            return pl.BlockSpec(shape, lambda i: (0, 0), pipeline_mode=param_mode)

        return pl.pallas_call(
            adversary_wrapper_kernel,
            out_shape=jax.ShapeDtypeStruct((B_P, OUT), out_dtype),
            grid=grid,
            in_specs=[
                # x: tiled along batch (pipelined, sharded across cores); true IN width
                pl.BlockSpec((TILE_B, IN), lambda i: (i, 0)),
                # weights / biases: constant index_map -> fetched once, VMEM-resident
                pspec((IN, HID_P)),
                pspec((1, HID_P)),
                pspec((HID_P, OUT)),
                pspec((1, OUT)),
            ],
            out_specs=pl.BlockSpec((TILE_B, OUT), lambda i: (i, 0)),
            compiler_params=pltpu.CompilerParams(
                dimension_semantics=("parallel",),
                vmem_limit_bytes=vmem_limit,
            ),
            cost_estimate=cost,
        )

    try:
        # single-buffer the resident params (constant index_map -> one copy suffices)
        out_p = jax.block_until_ready(
            build(pl.Buffered(1))(x_p, w1_p, b1_p, w2_p, b2_p))
    except Exception:
        # graceful fallback: default (double) buffering if pipeline_mode is unsupported
        out_p = build(None)(x_p, w1_p, b1_p, w2_p, b2_p)

    return out_p if B_P == B else out_p[:B]


# ---------------------------------------------------------------------- references
def reference_forward_f32(x, w1, b1, w2, b2):
    h = jnp.maximum(x @ w1 + b1, 0.0)
    return jnp.tanh(h @ w2 + b2)


def reference_forward_bf16(x, w1, b1, w2, b2):
    # same cast points as the kernel: bf16 MXU operands, f32 accumulation/epilogue
    h = jnp.dot(x.astype(jnp.bfloat16), w1.astype(jnp.bfloat16),
                preferred_element_type=jnp.float32) + b1
    h = jnp.maximum(h, 0.0)
    y = jnp.dot(h.astype(jnp.bfloat16), w2.astype(jnp.bfloat16),
                preferred_element_type=jnp.float32) + b2
    return jnp.tanh(y)


if __name__ == "__main__":
    key = jax.random.PRNGKey(0)
    kx, k1, kb1, k2, kb2 = jax.random.split(key, 5)

    # small shapes consistent with a linear head; B=256 gives a 2-step "parallel" grid.
    B, IN, HID, OUT = 256, 32, 32, 32

    x = jax.random.normal(kx, (B, IN), dtype=jnp.float32)
    # deterministic synthetic "checkpoint" (fan-in scaled normals, like nn.Linear init)
    w1 = jax.random.normal(k1, (IN, HID), dtype=jnp.float32) / jnp.sqrt(IN)
    b1 = jax.random.normal(kb1, (HID,), dtype=jnp.float32) * 0.01
    w2 = jax.random.normal(k2, (HID, OUT), dtype=jnp.float32) / jnp.sqrt(HID)
    b2 = jax.random.normal(kb2, (OUT,), dtype=jnp.float32) * 0.01

    params = prepare_params(w1, b1, w2, b2)          # one-time pad/cast (hoisted)
    out = adversary_wrapper_forward(x, params)
    out = jax.block_until_ready(out)
    assert out.shape == (B, OUT)

    out_f32 = out.astype(jnp.float32)
    # tight check vs. a reference with identical bf16 cast points (+ bf16 output rounding)
    ref_bf16 = reference_forward_bf16(x, w1, b1, w2, b2)
    assert jnp.allclose(out_f32, ref_bf16, atol=2e-2, rtol=2e-2)
    # sanity check vs. the pure-f32 reference
    ref_f32 = reference_forward_f32(x, w1, b1, w2, b2)
    assert jnp.allclose(out_f32, ref_f32, atol=5e-2, rtol=5e-2)

    print("KERNEL_OK")
</pallas_src>

<mosaic_0001>
module attributes {stable_mosaic.version = 11 : i64} {
  func.func @adversary_wrapper_kernel(%arg0: i32, %arg1: memref<128x32xf32, #tpu.memory_space<vmem>>, %arg2: memref<32x128xbf16, #tpu.memory_space<vmem>>, %arg3: memref<1x128xf32, #tpu.memory_space<vmem>>, %arg4: memref<128x32xbf16, #tpu.memory_space<vmem>>, %arg5: memref<1x32xf32, #tpu.memory_space<vmem>>, %arg6: memref<128x32xbf16, #tpu.memory_space<vmem>>) attributes {dimension_semantics = [#tpu.dimension_semantics<parallel>], iteration_bounds = array<i64: 2>, scalar_prefetch = 0 : i64, scratch_operands = 0 : i64, tpu.core_type = #tpu.core_type<tc>, window_params = [{transform_indices = @transform_0, window_bounds = array<i64: 128, 32>}, {pipeline_mode = #tpu.pipeline_mode<synchronous>, transform_indices = @transform_1, window_bounds = array<i64: 32, 128>}, {pipeline_mode = #tpu.pipeline_mode<synchronous>, transform_indices = @transform_2, window_bounds = array<i64: 1, 128>}, {pipeline_mode = #tpu.pipeline_mode<synchronous>, transform_indices = @transform_3, window_bounds = array<i64: 128, 32>}, {pipeline_mode = #tpu.pipeline_mode<synchronous>, transform_indices = @transform_4, window_bounds = array<i64: 1, 32>}, {transform_indices = @transform_5, window_bounds = array<i64: 128, 32>}]} {
    %c0 = arith.constant 0 : index
    %c0_0 = arith.constant 0 : index
    %0 = vector.load %arg1[%c0, %c0_0] : memref<128x32xf32, #tpu.memory_space<vmem>>, vector<128x32xf32>
    %1 = arith.truncf %0 : vector<128x32xf32> to vector<128x32xbf16>
    %c0_1 = arith.constant 0 : index
    %c0_2 = arith.constant 0 : index
    %2 = vector.load %arg2[%c0_1, %c0_2] : memref<32x128xbf16, #tpu.memory_space<vmem>>, vector<32x128xbf16>
    %cst = arith.constant dense<0.000000e+00> : vector<128x128xf32>
    %3 = tpu.matmul %1, %2, %cst {dimension_numbers = #tpu.dot_dimension_numbers<[1], [0], [0], [1], [0, 0, 1, 1], [], []>} : vector<128x32xbf16>, vector<32x128xbf16>, vector<128x128xf32> -> vector<128x128xf32>
    %c0_3 = arith.constant 0 : index
    %c0_4 = arith.constant 0 : index
    %4 = vector.load %arg3[%c0_3, %c0_4] : memref<1x128xf32, #tpu.memory_space<vmem>>, vector<1x128xf32>
    %5 = vector.broadcast %4 : vector<1x128xf32> to vector<128x128xf32>
    %6 = arith.addf %3, %5 : vector<128x128xf32>
    %cst_5 = arith.constant 0.000000e+00 : f32
    %7 = vector.broadcast %cst_5 : f32 to vector<128x128xf32>
    %8 = arith.maximumf %6, %7 : vector<128x128xf32>
    %9 = arith.truncf %8 : vector<128x128xf32> to vector<128x128xbf16>
    %c0_6 = arith.constant 0 : index
    %c0_7 = arith.constant 0 : index
    %10 = vector.load %arg4[%c0_6, %c0_7] : memref<128x32xbf16, #tpu.memory_space<vmem>>, vector<128x32xbf16>
    %cst_8 = arith.constant dense<0.000000e+00> : vector<128x32xf32>
    %11 = tpu.matmul %9, %10, %cst_8 {dimension_numbers = #tpu.dot_dimension_numbers<[1], [0], [0], [1], [0, 0, 1, 1], [], []>} : vector<128x128xbf16>, vector<128x32xbf16>, vector<128x32xf32> -> vector<128x32xf32>
    %c0_9 = arith.constant 0 : index
    %c0_10 = arith.constant 0 : index
    %12 = vector.load %arg5[%c0_9, %c0_10] : memref<1x32xf32, #tpu.memory_space<vmem>>, vector<1x32xf32>
    %13 = vector.broadcast %12 : vector<1x32xf32> to vector<128x32xf32>
    %14 = arith.addf %11, %13 : vector<128x32xf32>
    %15 = math.tanh %14 : vector<128x32xf32>
    %16 = arith.truncf %15 : vector<128x32xf32> to vector<128x32xbf16>
    %c0_11 = arith.constant 0 : index
    %c0_12 = arith.constant 0 : index
    %17 = vector.load %arg6[%c0_11, %c0_12] : memref<128x32xbf16, #tpu.memory_space<vmem>>, vector<128x32xbf16>
    tpu.vector_store %arg6[%c0_11, %c0_12], %16 {strides = array<i32>} : memref<128x32xbf16, #tpu.memory_space<vmem>>, vector<128x32xbf16>,
    return
  }
  func.func @transform_0(%arg0: i32) -> (i32, i32) {
    %c0_i32 = arith.constant 0 : i32
    %c0_i32_0 = arith.constant 0 : i32
    return %arg0, %c0_i32 : i32, i32
  }
  func.func @transform_1(%arg0: i32) -> (i32, i32) {
    %c0_i32 = arith.constant 0 : i32
    %c0_i32_0 = arith.constant 0 : i32
    %c0_i32_1 = arith.constant 0 : i32
    return %c0_i32, %c0_i32_0 : i32, i32
  }
  func.func @transform_2(%arg0: i32) -> (i32, i32) {
    %c0_i32 = arith.constant 0 : i32
    %c0_i32_0 = arith.constant 0 : i32
    %c0_i32_1 = arith.constant 0 : i32
    return %c0_i32, %c0_i32_0 : i32, i32
  }
  func.func @transform_3(%arg0: i32) -> (i32, i32) {
    %c0_i32 = arith.constant 0 : i32
    %c0_i32_0 = arith.constant 0 : i32
    %c0_i32_1 = arith.constant 0 : i32
    return %c0_i32, %c0_i32_0 : i32, i32
  }
  func.func @transform_4(%arg0: i32) -> (i32, i32) {
    %c0_i32 = arith.constant 0 : i32
    %c0_i32_0 = arith.constant 0 : i32
    %c0_i32_1 = arith.constant 0 : i32
    return %c0_i32, %c0_i32_0 : i32, i32
  }
  func.func @transform_5(%arg0: i32) -> (i32, i32) {
    %c0_i32 = arith.constant 0 : i32
    %c0_i32_0 = arith.constant 0 : i32
    return %arg0, %c0_i32 : i32, i32
  }
}

module attributes {stable_mosaic.version = 11 : i64} {
  func.func @adversary_wrapper_kernel(%arg0: i32, %arg1: memref<128x32xf32, #tpu.memory_space<vmem>>, %arg2: memref<32x128xbf16, #tpu.memory_space<vmem>>, %arg3: memref<1x128xf32, #tpu.memory_space<vmem>>, %arg4: memref<128x32xbf16, #tpu.memory_space<vmem>>, %arg5: memref<1x32xf32, #tpu.memory_space<vmem>>, %arg6: memref<128x32xbf16, #tpu.memory_space<vmem>>) attributes {dimension_semantics = [#tpu.dimension_semantics<parallel>], iteration_bounds = array<i64: 2>, scalar_prefetch = 0 : i64, scratch_operands = 0 : i64, tpu.core_type = #tpu.core_type<tc>, window_params = [{transform_indices = @transform_0, window_bounds = array<i64: 128, 32>}, {pipeline_mode = #tpu.pipeline_mode<synchronous>, transform_indices = @transform_1, window_bounds = array<i64: 32, 128>}, {pipeline_mode = #tpu.pipeline_mode<synchronous>, transform_indices = @transform_2, window_bounds = array<i64: 1, 128>}, {pipeline_mode = #tpu.pipeline_mode<synchronous>, transform_indices = @transform_3, window_bounds = array<i64: 128, 32>}, {pipeline_mode = #tpu.pipeline_mode<synchronous>, transform_indices = @transform_4, window_bounds = array<i64: 1, 32>}, {transform_indices = @transform_5, window_bounds = array<i64: 128, 32>}]} {
    %c0 = arith.constant 0 : index
    %c0_0 = arith.constant 0 : index
    %0 = vector.load %arg1[%c0, %c0_0] : memref<128x32xf32, #tpu.memory_space<vmem>>, vector<128x32xf32>
    %1 = arith.truncf %0 : vector<128x32xf32> to vector<128x32xbf16>
    %c0_1 = arith.constant 0 : index
    %c0_2 = arith.constant 0 : index
    %2 = vector.load %arg2[%c0_1, %c0_2] : memref<32x128xbf16, #tpu.memory_space<vmem>>, vector<32x128xbf16>
    %cst = arith.constant dense<0.000000e+00> : vector<128x128xf32>
    %3 = tpu.matmul %1, %2, %cst {dimension_numbers = #tpu.dot_dimension_numbers<[1], [0], [0], [1], [0, 0, 1, 1], [], []>} : vector<128x32xbf16>, vector<32x128xbf16>, vector<128x128xf32> -> vector<128x128xf32>
    %c0_3 = arith.constant 0 : index
    %c0_4 = arith.constant 0 : index
    %4 = vector.load %arg3[%c0_3, %c0_4] : memref<1x128xf32, #tpu.memory_space<vmem>>, vector<1x128xf32>
    %5 = vector.broadcast %4 : vector<1x128xf32> to vector<128x128xf32>
    %6 = arith.addf %3, %5 : vector<128x128xf32>
    %cst_5 = arith.constant 0.000000e+00 : f32
    %7 = vector.broadcast %cst_5 : f32 to vector<128x128xf32>
    %8 = arith.maximumf %6, %7 : vector<128x128xf32>
    %9 = arith.truncf %8 : vector<128x128xf32> to vector<128x128xbf16>
    %c0_6 = arith.constant 0 : index
    %c0_7 = arith.constant 0 : index
    %10 = vector.load %arg4[%c0_6, %c0_7] : memref<128x32xbf16, #tpu.memory_space<vmem>>, vector<128x32xbf16>
    %cst_8 = arith.constant dense<0.000000e+00> : vector<128x32xf32>
    %11 = tpu.matmul %9, %10, %cst_8 {dimension_numbers = #tpu.dot_dimension_numbers<[1], [0], [0], [1], [0, 0, 1, 1], [], []>} : vector<128x128xbf16>, vector<128x32xbf16>, vector<128x32xf32> -> vector<128x32xf32>
    %c0_9 = arith.constant 0 : index
    %c0_10 = arith.constant 0 : index
    %12 = vector.load %arg5[%c0_9, %c0_10] : memref<1x32xf32, #tpu.memory_space<vmem>>, vector<1x32xf32>
    %13 = vector.broadcast %12 : vector<1x32xf32> to vector<128x32xf32>
    %14 = arith.addf %11, %13 : vector<128x32xf32>
    %15 = math.tanh %14 : vector<128x32xf32>
    %16 = arith.truncf %15 : vector<128x32xf32> to vector<128x32xbf16>
    %c0_11 = arith.constant 0 : index
    %c0_12 = arith.constant 0 : index
    %17 = vector.load %arg6[%c0_11, %c0_12] : memref<128x32xbf16, #tpu.memory_space<vmem>>, vector<128x32xbf16>
    tpu.vector_store %arg6[%c0_11, %c0_12], %16 {strides = array<i32>} : memref<128x32xbf16, #tpu.memory_space<vmem>>, vector<128x32xbf16>,
    return
  }
  func.func @transform_0(%arg0: i32) -> (i32, i32) {
    %c0_i32 = arith.constant 0 : i32
    %c0_i32_0 = arith.constant 0 : i32
    return %arg0, %c0_i32 : i32, i32
  }
  func.func @transform_1(%arg0: i32) -> (i32, i32) {
    %c0_i32 = arith.constant 0 : i32
    %c0_i32_0 = arith.constant 0 : i32
    %c0_i32_1 = arith.constant 0 : i32
    return %c0_i32, %c0_i32_0 : i32, i32
  }
  func.func @transform_2(%arg0: i32) -> (i32, i32) {
    %c0_i32 = arith.constant 0 : i32
    %c0_i32_0 = arith.constant 0 : i32
    %c0_i32_1 = arith.constant 0 : i32
    return %c0_i32, %c0_i32_0 : i32, i32
  }
  func.func @transform_3(%arg0: i32) -> (i32, i32) {
    %c0_i32 = arith.constant 0 : i32
    %c0_i32_0 = arith.constant 0 : i32
    %c0_i32_1 = arith.constant 0 : i32
    return %c0_i32, %c0_i32_0 : i32, i32
  }
  func.func @transform_4(%arg0: i32) -> (i32, i32) {
    %c0_i32 = arith.constant 0 : i32
    %c0_i32_0 = arith.constant 0 : i32
    %c0_i32_1 = arith.constant 0 : i32
    return %c0_i32, %c0_i32_0 : i32, i32
  }
  func.func @transform_5(%arg0: i32) -> (i32, i32) {
    %c0_i32 = arith.constant 0 : i32
    %c0_i32_0 = arith.constant 0 : i32
    return %arg0, %c0_i32 : i32, i32
  }
}

</mosaic_0001>

<bundles_post_ra>
// kernel: tpu_custom_call.1
= control target key start
LH: loop header
LB: loop body
LE: loop exit
PB: predicated region body
PF: predicated region fallthrough
CT: control target
= control target key end

     0   :  { %s988_s18 = smov 0   ;;  %s1123_s0 = inlined_call_operand.vmem [shape: f32[256,32], index: 0, kind: input, shape index: {}]   ;;  %s1124_s1 = inlined_call_operand.vmem [shape: bf16[32,128], index: 1, kind: input, shape index: {}]   ;;  %s1125_s2 = inlined_call_operand.vmem [shape: f32[1,128], index: 2, kind: input, shape index: {}]   ;;  %s1126_s3 = inlined_call_operand.vmem [shape: bf16[128,32], index: 3, kind: input, shape index: {}]   ;;  %s1127_s4 = inlined_call_operand.vmem [shape: f32[1,32], index: 4, kind: input, shape index: {}]   ;;  %s1128_s5 = inlined_call_operand.vmem [shape: bf16[256,32], index: 5, kind: output, shape index: {}]  }
   0x1 LB: > { %s743_s19 = sadd.s32 4294967295, %s956_s18   ;;  %p747_p0 = scmp.ge.s32.totalorder %s956_s18, 1  ;;  %s956_s18 = sphi %s988_s18, %s15_s18  }
   0x2   : > { %p188_p1 = scmp.lt.s32.totalorder %s956_s18, 3 }
   0x4   : > { %p189_p2 = pnand %p747_p0, %p188_p1 }
   0x5   : > { %s748_s22 = sshll.u32 (!%p189_p2), %s743_s19, 4 }
   0x6   : > { %192 = sbr.rel (%p189_p2) target bundleno = 468 (0x1d4), region = 40  ;;  %p217_p3 = scmp.lt.s32.totalorder (!%p189_p2), %s748_s22, 31 }
   0xb   : > { %v908_v0 = vld [vmem:[%s1124_s1 + $0x8] sm:$0xff]   ;;  %v909_v1 = vld [vmem:[%s1124_s1] sm:$0xff]   ;;  %v910_v2 = vld [vmem:[%s1126_s3 + $0x38] sm:$0xff]   ;;  %s1130_s22 = smov (!%p217_p3, %s748_s22), 31  ;;  %vm276_vm0 = vcmask 261120   ;;  %vm670_vm1 = vcmask 257024  }
   0xc   : > { %832 = vmatprep.subr.bf16.mxu0 %v908_v0  ;;  %v911_v3 = vld [vmem:[%s1126_s3 + $0x30] sm:$0xff]   ;;  %884 = vmatprep.subr.bf16.mxu1 %v910_v2  ;;  %s749_s29 = sshll.u32 %s1130_s22, 3  ;;  %v912_v4 = vld [vmem:[%s1126_s3 + $0x28] sm:$0xff]   ;;  %v913_v16 = vld [vmem:[%s1126_s3 + $0x20] sm:$0xff]   ;;  %s751_s26 = sshll.u32 %s1130_s22, 2 }
   0xd   : > { %833 = vmatpush3.bf16.msra.mxu0 %v908_v0  ;;  %892 = vmatpush3.bf16.msra.mxu1 %v910_v2  ;;  %s1014_s7 = scalar_lea.vmem %s1123_s0, %s749_s29  ;;  %v914_v21 = vld [vmem:[%s1126_s3 + $0x18] sm:$0xff]   ;;  %v915_v31 = vld [vmem:[%s1126_s3 + $0x10] sm:$0xff]   ;;  %v916_v32 = vld [vmem:[%s1126_s3 + $0x8] sm:$0xff]   ;;  %s1078_s29 = scalar_lea.vmem %s1128_s5, %s751_s26 }
   0xe   : > { %834 = vmatprep.subr.bf16.mxu0 %v909_v1  ;;  %885 = vmatprep.subr.bf16.mxu1 %v911_v3  ;;  %v229_v5 = vld [vmem:[%s1014_s7] sm:$0xff]  ;;  %v230_v6 = vld [vmem:[%s1014_s7 + $0x8] sm:$0xff]  ;;  %v231_v7 = vld [vmem:[%s1014_s7 + $0x10] sm:$0xff] }
   0xf   : > { %v245_v8 = vpack.c.bf16 %v230_v6, %v229_v5  ;;  %v232_v9 = vld [vmem:[%s1014_s7 + $0x18] sm:$0xff]  ;;  %v233_v10 = vld [vmem:[%s1014_s7 + $0x20] sm:$0xff]  ;;  %v234_v11 = vld [vmem:[%s1014_s7 + $0x28] sm:$0xff] }
  0x10   : > { %v246_v12 = vpack.c.bf16 %v232_v9, %v231_v7  ;;  %v247_v13 = vpack.c.bf16 %v234_v11, %v233_v10  ;;  %v235_v14 = vld [vmem:[%s1014_s7 + $0x30] sm:$0xff]  ;;  %v236_v15 = vld [vmem:[%s1014_s7 + $0x38] sm:$0xff]  ;;  %v237_v17 = vld [vmem:[%s1014_s7 + $0x40] sm:$0xff] }
  0x11   : > { %835 = vmatpush3.bf16.msra.mxu0 %v909_v1  ;;  %893 = vmatpush3.bf16.msra.mxu1 %v911_v3  ;;  %v238_v18 = vld [vmem:[%s1014_s7 + $0x48] sm:$0xff]  ;;  %v248_v19 = vpack.c.bf16 %v236_v15, %v235_v14  ;;  %v239_v22 = vld [vmem:[%s1014_s7 + $0x50] sm:$0xff]  ;;  %v240_v23 = vld [vmem:[%s1014_s7 + $0x58] sm:$0xff] }
  0x12   : > { %852 = vmatprep.subr.bf16.mxu0 %v910_v2  ;;  %836 = vmatprep.mubr.msk.bf16.mxu0 %vm276_vm0, %v245_v8  ;;  %v249_v20 = vpack.c.bf16 %v238_v18, %v237_v17  ;;  %v241_v24 = vld [vmem:[%s1014_s7 + $0x60] sm:$0xff]  ;;  %v242_v25 = vld [vmem:[%s1014_s7 + $0x68] sm:$0xff]  ;;  %v250_v26 = vpack.c.bf16 %v240_v23, %v239_v22  ;;  %v243_v28 = vld [vmem:[%s1014_s7 + $0x70] sm:$0xff] }
  0x13   : > { %886 = vmatprep.subr.bf16.mxu1 %v912_v4  ;;  %v251_v27 = vpack.c.bf16 %v242_v25, %v241_v24  ;;  %v244_v29 = vld [vmem:[%s1014_s7 + $0x78] sm:$0xff]  ;;  %v917_v33 = vld [vmem:[%s1126_s3] sm:$0xff]  }
  0x14   : > { %837 = vmatmul.mubr.msk.bf16.vlgmr.msra.gmra.mxu0 %vm276_vm0, %v246_v12  ;;  %v252_v30 = vpack.c.bf16 %v244_v29, %v243_v28  ;;  %v752_v36 = vld [vmem:[%s1125_s2] ss:$0 sm:$0xff] }
  0x15   : > { %840 = vmatprep.mubr.msk.bf16.mxu0 %vm276_vm0, %v247_v13  ;;  %853 = vmatpush3.bf16.msra.mxu0 %v910_v2 }
  0x16   : > { %854 = vmatprep.subr.bf16.mxu0 %v911_v3  ;;  %894 = vmatpush3.bf16.msra.mxu1 %v912_v4 }
  0x17   : > { %887 = vmatprep.subr.bf16.mxu1 %v913_v16 }
  0x19   : > { %855 = vmatpush3.bf16.msra.mxu0 %v911_v3 }
  0x1a   : > { %856 = vmatprep.subr.bf16.mxu0 %v912_v4  ;;  %895 = vmatpush3.bf16.msra.mxu1 %v913_v16 }
  0x1b   : > { %888 = vmatprep.subr.bf16.mxu1 %v914_v21 }
  0x1c   : > { %841 = vmatmul.mubr.msk.bf16.gmra.mxu0 %vm276_vm0, %v248_v19 }
  0x1d   : > { %844 = vmatprep.mubr.msk.bf16.mxu0 %vm276_vm0, %v249_v20  ;;  %857 = vmatpush3.bf16.msra.mxu0 %v912_v4 }
  0x1e   : > { %858 = vmatprep.subr.bf16.mxu0 %v913_v16  ;;  %896 = vmatpush3.bf16.msra.mxu1 %v914_v21 }
  0x1f   : > { %889 = vmatprep.subr.bf16.mxu1 %v915_v31 }
  0x21   : > { %859 = vmatpush3.bf16.msra.mxu0 %v913_v16 }
  0x22   : > { %860 = vmatprep.subr.bf16.mxu0 %v914_v21  ;;  %897 = vmatpush3.bf16.msra.mxu1 %v915_v31 }
  0x23   : > { %890 = vmatprep.subr.bf16.mxu1 %v916_v32 }
  0x24   : > { %845 = vmatmul.mubr.msk.bf16.gmra.mxu0 %vm276_vm0, %v250_v26 }
  0x25   : > { %848 = vmatprep.mubr.msk.bf16.mxu0 %vm276_vm0, %v251_v27  ;;  %861 = vmatpush3.bf16.msra.mxu0 %v914_v21  ;;  %v1064_v27 = vld [vmem:[%s1127_s4] ss:$0 sm:$0xff] }
  0x26   : > { %862 = vmatprep.subr.bf16.mxu0 %v915_v31  ;;  %898 = vmatpush3.bf16.msra.mxu1 %v916_v32 }
  0x27   : > { %891 = vmatprep.subr.bf16.mxu1 %v917_v33 }
  0x29   : > { %863 = vmatpush3.bf16.msra.mxu0 %v915_v31 }
  0x2a   : > { %864 = vmatprep.subr.bf16.mxu0 %v916_v32  ;;  %899 = vmatpush3.bf16.msra.mxu1 %v917_v33 }
  0x2c   : > { %849 = vmatmul.mubr.msk.bf16.gmra.mxu0 %vm276_vm0, %v252_v30 }
  0x2d   : > { %865 = vmatpush3.bf16.msra.mxu0 %v916_v32 }
  0x2e   : > { %866 = vmatprep.subr.bf16.mxu0 %v917_v33 }
  0x31   : > { %867 = vmatpush3.bf16.msra.mxu0 %v917_v33 }
  0xd4   : > { %v838_v34 = vpop.f32.mrf.mxu0 }
  0xd5   : > { %v344_v40 = vadd.f32 %v838_v34, %v752_v36 }
  0xd6   : > { %v335_v35 = vpop.f32.mrf.mxu0 }
  0xd7   : > { %v336_v38 = vadd.f32 %v752_v36, %v335_v35  ;;  %v400_v47 = vmax.f32 %v344_v40, 0.0 }
  0xd8   : > { %v839_v37 = vpop.f32.mrf.mxu0 }
  0xd9   : > { %v347_v39 = vadd.f32 %v839_v37, %v752_v36  ;;  %v398_v45 = vmax.f32 %v336_v38, 0.0 }
  0xda   : > { %v338_v41 = vpop.f32.mrf.mxu0 }
  0xdb   : > { %v339_v42 = vadd.f32 %v752_v36, %v338_v41  ;;  %v401_v43 = vmax.f32 %v347_v39, 0.0 }
  0xdc   : > { %v842_v44 = vpop.f32.mrf.mxu0 }
  0xdd   : > { %v399_v46 = vmax.f32 %v339_v42, 0.0  ;;  %v415_v50 = vpack.c.bf16 %v401_v43, %v400_v47  ;;  %v360_v54 = vadd.f32 %v842_v44, %v752_v36 }
  0xde   : > { %v351_v48 = vpop.f32.mrf.mxu0 }
  0xdf   : > { %v414_v49 = vpack.c.bf16 %v399_v46, %v398_v45  ;;  %v352_v52 = vadd.f32 %v752_v36, %v351_v48  ;;  %v404_v61 = vmax.f32 %v360_v54, 0.0 }
  0xe0   : > { %v843_v51 = vpop.f32.mrf.mxu0 }
  0xe1   : > { %v363_v53 = vadd.f32 %v843_v51, %v752_v36  ;;  %868 = vmatprep.mubr.bf16.mxu0 %v414_v49  ;;  %v402_v59 = vmax.f32 %v352_v52, 0.0 }
  0xe2   : > { %v354_v55 = vpop.f32.mrf.mxu0  ;;  %869 = vmatmul.mubr.bf16.vlgmr.msra.gmra.mxu0 %v415_v50 }
  0xe3   : > { %v355_v56 = vadd.f32 %v752_v36, %v354_v55  ;;  %v405_v57 = vmax.f32 %v363_v53, 0.0 }
  0xe4   : > { %v846_v58 = vpop.f32.mrf.mxu0 }
  0xe5   : > { %v403_v60 = vmax.f32 %v355_v56, 0.0  ;;  %v417_v0 = vpack.c.bf16 %v405_v57, %v404_v61  ;;  %v376_v4 = vadd.f32 %v846_v58, %v752_v36 }
  0xe6   : > { %v367_v62 = vpop.f32.mrf.mxu0 }
  0xe7   : > { %v416_v63 = vpack.c.bf16 %v403_v60, %v402_v59  ;;  %v368_v2 = vadd.f32 %v752_v36, %v367_v62  ;;  %v408_v11 = vmax.f32 %v376_v4, 0.0 }
  0xe8   : > { %v847_v1 = vpop.f32.mrf.mxu0 }
  0xe9   : > { %v379_v3 = vadd.f32 %v847_v1, %v752_v36  ;;  %872 = vmatprep.mubr.bf16.mxu1 %v416_v63  ;;  %v406_v9 = vmax.f32 %v368_v2, 0.0 }
  0xea   : > { %v370_v5 = vpop.f32.mrf.mxu0  ;;  %873 = vmatmul.mubr.bf16.vlgmr.msra.gmra.mxu1 %v417_v0 }
  0xeb   : > { %v371_v6 = vadd.f32 %v752_v36, %v370_v5  ;;  %v409_v7 = vmax.f32 %v379_v3, 0.0 }
  0xec   : > { %v850_v8 = vpop.f32.mrf.mxu0 }
  0xed   : > { %v407_v10 = vmax.f32 %v371_v6, 0.0  ;;  %v419_v14 = vpack.c.bf16 %v409_v7, %v408_v11  ;;  %v392_v18 = vadd.f32 %v850_v8, %v752_v36 }
  0xee   : > { %v383_v12 = vpop.f32.mrf.mxu0 }
  0xef   : > { %v418_v13 = vpack.c.bf16 %v407_v10, %v406_v9  ;;  %v384_v16 = vadd.f32 %v752_v36, %v383_v12  ;;  %v412_v24 = vmax.f32 %v392_v18, 0.0 }
  0xf0   : > { %v851_v15 = vpop.f32.mrf.mxu0 }
  0xf1   : > { %v395_v17 = vadd.f32 %v851_v15, %v752_v36  ;;  %876 = vmatprep.mubr.bf16.mxu1 %v418_v13  ;;  %v410_v22 = vmax.f32 %v384_v16, 0.0 }
  0xf2   : > { %v386_v19 = vpop.f32.mrf.mxu0  ;;  %877 = vmatmul.mubr.bf16.gmra.mxu1 %v419_v14 }
  0xf3   : > { %v387_v20 = vadd.f32 %v752_v36, %v386_v19  ;;  %v413_v21 = vmax.f32 %v395_v17, 0.0 }
  0xf5   : > { %v411_v23 = vmax.f32 %v387_v20, 0.0  ;;  %v421_v26 = vpack.c.bf16 %v413_v21, %v412_v24 }
  0xf7   : > { %v420_v25 = vpack.c.bf16 %v411_v23, %v410_v22 }
  0xf9   : > { %880 = vmatprep.mubr.bf16.mxu1 %v420_v25 }
  0xfa   : > { %881 = vmatmul.mubr.bf16.gmra.mxu1 %v421_v26 }
 0x1a2   : > { %v870_v28 = vpop.f32.mrf.mxu0 }
 0x1a3   : > { %v536_v29 = vadd.f32 %v870_v28, %v1064_v27 }
 0x1a4   : > { %v527_v30 = vpop.f32.mrf.mxu0 }
 0x1a5   : > { %918 = vtanh.f32 %v536_v29  ;;  %v528_v31 = vadd.f32 %v1064_v27, %v527_v30 }
 0x1a6   : > { %v871_v32 = vpop.f32.mrf.mxu0 }
 0x1a7   : > { %920 = vtanh.f32 %v528_v31  ;;  %v539_v33 = vadd.f32 %v871_v32, %v1064_v27 }
 0x1a8   : > { %v530_v34 = vpop.f32.mrf.mxu0 }
 0x1a9   : > { %922 = vtanh.f32 %v539_v33  ;;  %v531_v35 = vadd.f32 %v1064_v27, %v530_v34 }
 0x1aa   : > { %v874_v36 = vpop.f32.mrf.mxu1 }
 0x1ab   : > { %924 = vtanh.f32 %v531_v35  ;;  %v552_v37 = vadd.f32 %v874_v36, %v1064_v27 }
 0x1ac   : > { %v543_v38 = vpop.f32.mrf.mxu1 }
 0x1ad   : > { %926 = vtanh.f32 %v552_v37  ;;  %v544_v39 = vadd.f32 %v1064_v27, %v543_v38 }
 0x1ae   : > { %v875_v40 = vpop.f32.mrf.mxu1 }
 0x1af   : > { %928 = vtanh.f32 %v544_v39  ;;  %v555_v41 = vadd.f32 %v875_v40, %v1064_v27 }
 0x1b0   : > { %v546_v42 = vpop.f32.mrf.mxu1 }
 0x1b1   : > { %930 = vtanh.f32 %v555_v41  ;;  %v547_v43 = vadd.f32 %v1064_v27, %v546_v42 }
 0x1b2   : > { %v919_v44 = vpop.eup %918  ;;  %v878_v45 = vpop.f32.mrf.mxu1 }
 0x1b3   : > { %v792_v46 = vpack.c.bf16 %v919_v44, %v919_v44  ;;  %932 = vtanh.f32 %v547_v43  ;;  %v568_v47 = vadd.f32 %v878_v45, %v1064_v27 }
 0x1b4   : > { %v921_v48 = vpop.eup %920  ;;  %v559_v49 = vpop.f32.mrf.mxu1 }
 0x1b5   : > { %673 = vst.msk [vmem:[%s1078_s29 + $0x8] sm:$0xf] %vm670_vm1, %v792_v46  ;;  %v790_v50 = vpack.c.bf16 %v921_v48, %v921_v48  ;;  %934 = vtanh.f32 %v568_v47  ;;  %v560_v51 = vadd.f32 %v1064_v27, %v559_v49 }
 0x1b6   : > { %v923_v52 = vpop.eup %922  ;;  %v879_v53 = vpop.f32.mrf.mxu1 }
 0x1b7   : > { %671 = vst.msk [vmem:[%s1078_s29] sm:$0xf] %vm670_vm1, %v790_v50  ;;  %v793_v54 = vpack.c.bf16 %v923_v52, %v923_v52  ;;  %936 = vtanh.f32 %v560_v51  ;;  %v571_v55 = vadd.f32 %v879_v53, %v1064_v27 }
 0x1b8   : > { %v925_v56 = vpop.eup %924  ;;  %v562_v57 = vpop.f32.mrf.mxu1 }
 0x1b9   : > { %674 = vst.msk [vmem:[%s1078_s29 + $0xc] sm:$0xf] %vm670_vm1, %v793_v54  ;;  %v791_v58 = vpack.c.bf16 %v925_v56, %v925_v56  ;;  %938 = vtanh.f32 %v571_v55  ;;  %v563_v59 = vadd.f32 %v1064_v27, %v562_v57 }
 0x1ba   : > { %v927_v60 = vpop.eup %926  ;;  %v882_v61 = vpop.f32.mrf.mxu1 }
 0x1bb   : > { %672 = vst.msk [vmem:[%s1078_s29 + $0x4] sm:$0xf] %vm670_vm1, %v791_v58  ;;  %v796_v62 = vpack.c.bf16 %v927_v60, %v927_v60  ;;  %940 = vtanh.f32 %v563_v59  ;;  %v584_v63 = vadd.f32 %v882_v61, %v1064_v27 }
 0x1bc   : > { %v929_v0 = vpop.eup %928  ;;  %v575_v1 = vpop.f32.mrf.mxu1 }
 0x1bd   : > { %677 = vst.msk [vmem:[%s1078_s29 + $0x18] sm:$0xf] %vm670_vm1, %v796_v62  ;;  %v794_v2 = vpack.c.bf16 %v929_v0, %v929_v0  ;;  %942 = vtanh.f32 %v584_v63  ;;  %v576_v3 = vadd.f32 %v1064_v27, %v575_v1 }
 0x1be   : > { %v931_v4 = vpop.eup %930  ;;  %v883_v5 = vpop.f32.mrf.mxu1 }
 0x1bf   : > { %675 = vst.msk [vmem:[%s1078_s29 + $0x10] sm:$0xf] %vm670_vm1, %v794_v2  ;;  %v797_v6 = vpack.c.bf16 %v931_v4, %v931_v4  ;;  %944 = vtanh.f32 %v576_v3  ;;  %v587_v7 = vadd.f32 %v883_v5, %v1064_v27 }
 0x1c0   : > { %v933_v8 = vpop.eup %932  ;;  %v578_v9 = vpop.f32.mrf.mxu1 }
 0x1c1   : > { %678 = vst.msk [vmem:[%s1078_s29 + $0x1c] sm:$0xf] %vm670_vm1, %v797_v6  ;;  %v795_v10 = vpack.c.bf16 %v933_v8, %v933_v8  ;;  %946 = vtanh.f32 %v587_v7  ;;  %v579_v11 = vadd.f32 %v1064_v27, %v578_v9 }
 0x1c2   : > { %v935_v12 = vpop.eup %934 }
 0x1c3   : > { %676 = vst.msk [vmem:[%s1078_s29 + $0x14] sm:$0xf] %vm670_vm1, %v795_v10  ;;  %v800_v13 = vpack.c.bf16 %v935_v12, %v935_v12  ;;  %948 = vtanh.f32 %v579_v11 }
 0x1c4   : > { %v937_v14 = vpop.eup %936 }
 0x1c5   : > { %681 = vst.msk [vmem:[%s1078_s29 + $0x28] sm:$0xf] %vm670_vm1, %v800_v13  ;;  %v798_v15 = vpack.c.bf16 %v937_v14, %v937_v14 }
 0x1c6   : > { %v939_v16 = vpop.eup %938 }
 0x1c7   : > { %679 = vst.msk [vmem:[%s1078_s29 + $0x20] sm:$0xf] %vm670_vm1, %v798_v15  ;;  %v801_v17 = vpack.c.bf16 %v939_v16, %v939_v16 }
 0x1c8   : > { %v941_v18 = vpop.eup %940 }
 0x1c9   : > { %682 = vst.msk [vmem:[%s1078_s29 + $0x2c] sm:$0xf] %vm670_vm1, %v801_v17  ;;  %v799_v19 = vpack.c.bf16 %v941_v18, %v941_v18 }
 0x1ca   : > { %v943_v20 = vpop.eup %942 }
 0x1cb   : > { %680 = vst.msk [vmem:[%s1078_s29 + $0x24] sm:$0xf] %vm670_vm1, %v799_v19  ;;  %v804_v21 = vpack.c.bf16 %v943_v20, %v943_v20 }
 0x1cc   : > { %v945_v22 = vpop.eup %944 }
 0x1cd   : > { %685 = vst.msk [vmem:[%s1078_s29 + $0x38] sm:$0xf] %vm670_vm1, %v804_v21  ;;  %v802_v23 = vpack.c.bf16 %v945_v22, %v945_v22 }
 0x1ce   : > { %v947_v24 = vpop.eup %946 }
 0x1cf   : > { %683 = vst.msk [vmem:[%s1078_s29 + $0x30] sm:$0xf] %vm670_vm1, %v802_v23  ;;  %v805_v25 = vpack.c.bf16 %v947_v24, %v947_v24 }
 0x1d0   : > { %v949_v26 = vpop.eup %948 }
 0x1d1   : > { %686 = vst.msk [vmem:[%s1078_s29 + $0x3c] sm:$0xf] %vm670_vm1, %v805_v25  ;;  %v803_v27 = vpack.c.bf16 %v949_v26, %v949_v26 }
 0x1d3   : > { %684 = vst.msk [vmem:[%s1078_s29 + $0x34] sm:$0xf] %vm670_vm1, %v803_v27 }
 0x1d4 PF: > { %s15_s18 = sadd.s32 1, %s956_s18  }
 0x1d5   : > { %p12_p4 = scmp.ge.s32.totalorder %s15_s18, 4  }
 0x1d7   :  { %14 = sbr.rel (!%p12_p4) target bundleno = 1 (0x1), region = 70 }

// kernel: tpu_custom_call.1
= control target key start
LH: loop header
LB: loop body
LE: loop exit
PB: predicated region body
PF: predicated region fallthrough
CT: control target
= control target key end

     0   :  { %s988_s18 = smov 0   ;;  %s1123_s0 = inlined_call_operand.vmem [shape: f32[256,32], index: 0, kind: input, shape index: {}]   ;;  %s1124_s1 = inlined_call_operand.vmem [shape: bf16[32,128], index: 1, kind: input, shape index: {}]   ;;  %s1125_s2 = inlined_call_operand.vmem [shape: f32[1,128], index: 2, kind: input, shape index: {}]   ;;  %s1126_s3 = inlined_call_operand.vmem [shape: bf16[128,32], index: 3, kind: input, shape index: {}]   ;;  %s1127_s4 = inlined_call_operand.vmem [shape: f32[1,32], index: 4, kind: input, shape index: {}]   ;;  %s1128_s5 = inlined_call_operand.vmem [shape: bf16[256,32], index: 5, kind: output, shape index: {}]  }
   0x1 LB: > { %s743_s19 = sadd.s32 4294967295, %s956_s18   ;;  %p747_p0 = scmp.ge.s32.totalorder %s956_s18, 1  ;;  %s956_s18 = sphi %s988_s18, %s15_s18  }
   0x2   : > { %p188_p1 = scmp.lt.s32.totalorder %s956_s18, 3 }
   0x4   : > { %p189_p2 = pnand %p747_p0, %p188_p1 }
   0x5   : > { %s748_s22 = sshll.u32 (!%p189_p2), %s743_s19, 4 }
   0x6   : > { %192 = sbr.rel (%p189_p2) target bundleno = 468 (0x1d4), region = 40  ;;  %p217_p3 = scmp.lt.s32.totalorder (!%p189_p2), %s748_s22, 31 }
   0xb   : > { %v908_v0 = vld [vmem:[%s1124_s1 + $0x8] sm:$0xff]   ;;  %v909_v1 = vld [vmem:[%s1124_s1] sm:$0xff]   ;;  %v910_v2 = vld [vmem:[%s1126_s3 + $0x38] sm:$0xff]   ;;  %s1130_s22 = smov (!%p217_p3, %s748_s22), 31  ;;  %vm276_vm0 = vcmask 261120   ;;  %vm670_vm1 = vcmask 257024  }
   0xc   : > { %832 = vmatprep.subr.bf16.mxu0 %v908_v0  ;;  %v911_v3 = vld [vmem:[%s1126_s3 + $0x30] sm:$0xff]   ;;  %884 = vmatprep.subr.bf16.mxu1 %v910_v2  ;;  %s749_s29 = sshll.u32 %s1130_s22, 3  ;;  %v912_v4 = vld [vmem:[%s1126_s3 + $0x28] sm:$0xff]   ;;  %v913_v16 = vld [vmem:[%s1126_s3 + $0x20] sm:$0xff]   ;;  %s751_s26 = sshll.u32 %s1130_s22, 2 }
   0xd   : > { %833 = vmatpush3.bf16.msra.mxu0 %v908_v0  ;;  %892 = vmatpush3.bf16.msra.mxu1 %v910_v2  ;;  %s1014_s7 = scalar_lea.vmem %s1123_s0, %s749_s29  ;;  %v914_v21 = vld [vmem:[%s1126_s3 + $0x18] sm:$0xff]   ;;  %v915_v31 = vld [vmem:[%s1126_s3 + $0x10] sm:$0xff]   ;;  %v916_v32 = vld [vmem:[%s1126_s3 + $0x8] sm:$0xff]   ;;  %s1078_s29 = scalar_lea.vmem %s1128_s5, %s751_s26 }
   0xe   : > { %834 = vmatprep.subr.bf16.mxu0 %v909_v1  ;;  %885 = vmatprep.subr.bf16.mxu1 %v911_v3  ;;  %v229_v5 = vld [vmem:[%s1014_s7] sm:$0xff]  ;;  %v230_v6 = vld [vmem:[%s1014_s7 + $0x8] sm:$0xff]  ;;  %v231_v7 = vld [vmem:[%s1014_s7 + $0x10] sm:$0xff] }
   0xf   : > { %v245_v8 = vpack.c.bf16 %v230_v6, %v229_v5  ;;  %v232_v9 = vld [vmem:[%s1014_s7 + $0x18] sm:$0xff]  ;;  %v233_v10 = vld [vmem:[%s1014_s7 + $0x20] sm:$0xff]  ;;  %v234_v11 = vld [vmem:[%s1014_s7 + $0x28] sm:$0xff] }
  0x10   : > { %v246_v12 = vpack.c.bf16 %v232_v9, %v231_v7  ;;  %v247_v13 = vpack.c.bf16 %v234_v11, %v233_v10  ;;  %v235_v14 = vld [vmem:[%s1014_s7 + $0x30] sm:$0xff]  ;;  %v236_v15 = vld [vmem:[%s1014_s7 + $0x38] sm:$0xff]  ;;  %v237_v17 = vld [vmem:[%s1014_s7 + $0x40] sm:$0xff] }
  0x11   : > { %835 = vmatpush3.bf16.msra.mxu0 %v909_v1  ;;  %893 = vmatpush3.bf16.msra.mxu1 %v911_v3  ;;  %v238_v18 = vld [vmem:[%s1014_s7 + $0x48] sm:$0xff]  ;;  %v248_v19 = vpack.c.bf16 %v236_v15, %v235_v14  ;;  %v239_v22 = vld [vmem:[%s1014_s7 + $0x50] sm:$0xff]  ;;  %v240_v23 = vld [vmem:[%s1014_s7 + $0x58] sm:$0xff] }
  0x12   : > { %852 = vmatprep.subr.bf16.mxu0 %v910_v2  ;;  %836 = vmatprep.mubr.msk.bf16.mxu0 %vm276_vm0, %v245_v8  ;;  %v249_v20 = vpack.c.bf16 %v238_v18, %v237_v17  ;;  %v241_v24 = vld [vmem:[%s1014_s7 + $0x60] sm:$0xff]  ;;  %v242_v25 = vld [vmem:[%s1014_s7 + $0x68] sm:$0xff]  ;;  %v250_v26 = vpack.c.bf16 %v240_v23, %v239_v22  ;;  %v243_v28 = vld [vmem:[%s1014_s7 + $0x70] sm:$0xff] }
  0x13   : > { %886 = vmatprep.subr.bf16.mxu1 %v912_v4  ;;  %v251_v27 = vpack.c.bf16 %v242_v25, %v241_v24  ;;  %v244_v29 = vld [vmem:[%s1014_s7 + $0x78] sm:$0xff]  ;;  %v917_v33 = vld [vmem:[%s1126_s3] sm:$0xff]  }
  0x14   : > { %837 = vmatmul.mubr.msk.bf16.vlgmr.msra.gmra.mxu0 %vm276_vm0, %v246_v12  ;;  %v252_v30 = vpack.c.bf16 %v244_v29, %v243_v28  ;;  %v752_v36 = vld [vmem:[%s1125_s2] ss:$0 sm:$0xff] }
  0x15   : > { %840 = vmatprep.mubr.msk.bf16.mxu0 %vm276_vm0, %v247_v13  ;;  %853 = vmatpush3.bf16.msra.mxu0 %v910_v2 }
  0x16   : > { %854 = vmatprep.subr.bf16.mxu0 %v911_v3  ;;  %894 = vmatpush3.bf16.msra.mxu1 %v912_v4 }
  0x17   : > { %887 = vmatprep.subr.bf16.mxu1 %v913_v16 }
  0x19   : > { %855 = vmatpush3.bf16.msra.mxu0 %v911_v3 }
  0x1a   : > { %856 = vmatprep.subr.bf16.mxu0 %v912_v4  ;;  %895 = vmatpush3.bf16.msra.mxu1 %v913_v16 }
  0x1b   : > { %888 = vmatprep.subr.bf16.mxu1 %v914_v21 }
  0x1c   : > { %841 = vmatmul.mubr.msk.bf16.gmra.mxu0 %vm276_vm0, %v248_v19 }
  0x1d   : > { %844 = vmatprep.mubr.msk.bf16.mxu0 %vm276_vm0, %v249_v20  ;;  %857 = vmatpush3.bf16.msra.mxu0 %v912_v4 }
  0x1e   : > { %858 = vmatprep.subr.bf16.mxu0 %v913_v16  ;;  %896 = vmatpush3.bf16.msra.mxu1 %v914_v21 }
  0x1f   : > { %889 = vmatprep.subr.bf16.mxu1 %v915_v31 }
  0x21   : > { %859 = vmatpush3.bf16.msra.mxu0 %v913_v16 }
  0x22   : > { %860 = vmatprep.subr.bf16.mxu0 %v914_v21  ;;  %897 = vmatpush3.bf16.msra.mxu1 %v915_v31 }
  0x23   : > { %890 = vmatprep.subr.bf16.mxu1 %v916_v32 }
  0x24   : > { %845 = vmatmul.mubr.msk.bf16.gmra.mxu0 %vm276_vm0, %v250_v26 }
  0x25   : > { %848 = vmatprep.mubr.msk.bf16.mxu0 %vm276_vm0, %v251_v27  ;;  %861 = vmatpush3.bf16.msra.mxu0 %v914_v21  ;;  %v1064_v27 = vld [vmem:[%s1127_s4] ss:$0 sm:$0xff] }
  0x26   : > { %862 = vmatprep.subr.bf16.mxu0 %v915_v31  ;;  %898 = vmatpush3.bf16.msra.mxu1 %v916_v32 }
  0x27   : > { %891 = vmatprep.subr.bf16.mxu1 %v917_v33 }
  0x29   : > { %863 = vmatpush3.bf16.msra.mxu0 %v915_v31 }
  0x2a   : > { %864 = vmatprep.subr.bf16.mxu0 %v916_v32  ;;  %899 = vmatpush3.bf16.msra.mxu1 %v917_v33 }
  0x2c   : > { %849 = vmatmul.mubr.msk.bf16.gmra.mxu0 %vm276_vm0, %v252_v30 }
  0x2d   : > { %865 = vmatpush3.bf16.msra.mxu0 %v916_v32 }
  0x2e   : > { %866 = vmatprep.subr.bf16.mxu0 %v917_v33 }
  0x31   : > { %867 = vmatpush3.bf16.msra.mxu0 %v917_v33 }
  0xd4   : > { %v838_v34 = vpop.f32.mrf.mxu0 }
  0xd5   : > { %v344_v40 = vadd.f32 %v838_v34, %v752_v36 }
  0xd6   : > { %v335_v35 = vpop.f32.mrf.mxu0 }
  0xd7   : > { %v336_v38 = vadd.f32 %v752_v36, %v335_v35  ;;  %v400_v47 = vmax.f32 %v344_v40, 0.0 }
  0xd8   : > { %v839_v37 = vpop.f32.mrf.mxu0 }
  0xd9   : > { %v347_v39 = vadd.f32 %v839_v37, %v752_v36  ;;  %v398_v45 = vmax.f32 %v336_v38, 0.0 }
  0xda   : > { %v338_v41 = vpop.f32.mrf.mxu0 }
  0xdb   : > { %v339_v42 = vadd.f32 %v752_v36, %v338_v41  ;;  %v401_v43 = vmax.f32 %v347_v39, 0.0 }
  0xdc   : > { %v842_v44 = vpop.f32.mrf.mxu0 }
  0xdd   : > { %v399_v46 = vmax.f32 %v339_v42, 0.0  ;;  %v415_v50 = vpack.c.bf16 %v401_v43, %v400_v47  ;;  %v360_v54 = vadd.f32 %v842_v44, %v752_v36 }
  0xde   : > { %v351_v48 = vpop.f32.mrf.mxu0 }
  0xdf   : > { %v414_v49 = vpack.c.bf16 %v399_v46, %v398_v45  ;;  %v352_v52 = vadd.f32 %v752_v36, %v351_v48  ;;  %v404_v61 = vmax.f32 %v360_v54, 0.0 }
  0xe0   : > { %v843_v51 = vpop.f32.mrf.mxu0 }
  0xe1   : > { %v363_v53 = vadd.f32 %v843_v51, %v752_v36  ;;  %868 = vmatprep.mubr.bf16.mxu0 %v414_v49  ;;  %v402_v59 = vmax.f32 %v352_v52, 0.0 }
  0xe2   : > { %v354_v55 = vpop.f32.mrf.mxu0  ;;  %869 = vmatmul.mubr.bf16.vlgmr.msra.gmra.mxu0 %v415_v50 }
  0xe3   : > { %v355_v56 = vadd.f32 %v752_v36, %v354_v55  ;;  %v405_v57 = vmax.f32 %v363_v53, 0.0 }
  0xe4   : > { %v846_v58 = vpop.f32.mrf.mxu0 }
  0xe5   : > { %v403_v60 = vmax.f32 %v355_v56, 0.0  ;;  %v417_v0 = vpack.c.bf16 %v405_v57, %v404_v61  ;;  %v376_v4 = vadd.f32 %v846_v58, %v752_v36 }
  0xe6   : > { %v367_v62 = vpop.f32.mrf.mxu0 }
  0xe7   : > { %v416_v63 = vpack.c.bf16 %v403_v60, %v402_v59  ;;  %v368_v2 = vadd.f32 %v752_v36, %v367_v62  ;;  %v408_v11 = vmax.f32 %v376_v4, 0.0 }
  0xe8   : > { %v847_v1 = vpop.f32.mrf.mxu0 }
  0xe9   : > { %v379_v3 = vadd.f32 %v847_v1, %v752_v36  ;;  %872 = vmatprep.mubr.bf16.mxu1 %v416_v63  ;;  %v406_v9 = vmax.f32 %v368_v2, 0.0 }
  0xea   : > { %v370_v5 = vpop.f32.mrf.mxu0  ;;  %873 = vmatmul.mubr.bf16.vlgmr.msra.gmra.mxu1 %v417_v0 }
  0xeb   : > { %v371_v6 = vadd.f32 %v752_v36, %v370_v5  ;;  %v409_v7 = vmax.f32 %v379_v3, 0.0 }
  0xec   : > { %v850_v8 = vpop.f32.mrf.mxu0 }
  0xed   : > { %v407_v10 = vmax.f32 %v371_v6, 0.0  ;;  %v419_v14 = vpack.c.bf16 %v409_v7, %v408_v11  ;;  %v392_v18 = vadd.f32 %v850_v8, %v752_v36 }
  0xee   : > { %v383_v12 = vpop.f32.mrf.mxu0 }
  0xef   : > { %v418_v13 = vpack.c.bf16 %v407_v10, %v406_v9  ;;  %v384_v16 = vadd.f32 %v752_v36, %v383_v12  ;;  %v412_v24 = vmax.f32 %v392_v18, 0.0 }
  0xf0   : > { %v851_v15 = vpop.f32.mrf.mxu0 }
  0xf1   : > { %v395_v17 = vadd.f32 %v851_v15, %v752_v36  ;;  %876 = vmatprep.mubr.bf16.mxu1 %v418_v13  ;;  %v410_v22 = vmax.f32 %v384_v16, 0.0 }
  0xf2   : > { %v386_v19 = vpop.f32.mrf.mxu0  ;;  %877 = vmatmul.mubr.bf16.gmra.mxu1 %v419_v14 }
  0xf3   : > { %v387_v20 = vadd.f32 %v752_v36, %v386_v19  ;;  %v413_v21 = vmax.f32 %v395_v17, 0.0 }
  0xf5   : > { %v411_v23 = vmax.f32 %v387_v20, 0.0  ;;  %v421_v26 = vpack.c.bf16 %v413_v21, %v412_v24 }
  0xf7   : > { %v420_v25 = vpack.c.bf16 %v411_v23, %v410_v22 }
  0xf9   : > { %880 = vmatprep.mubr.bf16.mxu1 %v420_v25 }
  0xfa   : > { %881 = vmatmul.mubr.bf16.gmra.mxu1 %v421_v26 }
 0x1a2   : > { %v870_v28 = vpop.f32.mrf.mxu0 }
 0x1a3   : > { %v536_v29 = vadd.f32 %v870_v28, %v1064_v27 }
 0x1a4   : > { %v527_v30 = vpop.f32.mrf.mxu0 }
 0x1a5   : > { %918 = vtanh.f32 %v536_v29  ;;  %v528_v31 = vadd.f32 %v1064_v27, %v527_v30 }
 0x1a6   : > { %v871_v32 = vpop.f32.mrf.mxu0 }
 0x1a7   : > { %920 = vtanh.f32 %v528_v31  ;;  %v539_v33 = vadd.f32 %v871_v32, %v1064_v27 }
 0x1a8   : > { %v530_v34 = vpop.f32.mrf.mxu0 }
 0x1a9   : > { %922 = vtanh.f32 %v539_v33  ;;  %v531_v35 = vadd.f32 %v1064_v27, %v530_v34 }
 0x1aa   : > { %v874_v36 = vpop.f32.mrf.mxu1 }
 0x1ab   : > { %924 = vtanh.f32 %v531_v35  ;;  %v552_v37 = vadd.f32 %v874_v36, %v1064_v27 }
 0x1ac   : > { %v543_v38 = vpop.f32.mrf.mxu1 }
 0x1ad   : > { %926 = vtanh.f32 %v552_v37  ;;  %v544_v39 = vadd.f32 %v1064_v27, %v543_v38 }
 0x1ae   : > { %v875_v40 = vpop.f32.mrf.mxu1 }
 0x1af   : > { %928 = vtanh.f32 %v544_v39  ;;  %v555_v41 = vadd.f32 %v875_v40, %v1064_v27 }
 0x1b0   : > { %v546_v42 = vpop.f32.mrf.mxu1 }
 0x1b1   : > { %930 = vtanh.f32 %v555_v41  ;;  %v547_v43 = vadd.f32 %v1064_v27, %v546_v42 }
 0x1b2   : > { %v919_v44 = vpop.eup %918  ;;  %v878_v45 = vpop.f32.mrf.mxu1 }
 0x1b3   : > { %v792_v46 = vpack.c.bf16 %v919_v44, %v919_v44  ;;  %932 = vtanh.f32 %v547_v43  ;;  %v568_v47 = vadd.f32 %v878_v45, %v1064_v27 }
 0x1b4   : > { %v921_v48 = vpop.eup %920  ;;  %v559_v49 = vpop.f32.mrf.mxu1 }
 0x1b5   : > { %673 = vst.msk [vmem:[%s1078_s29 + $0x8] sm:$0xf] %vm670_vm1, %v792_v46  ;;  %v790_v50 = vpack.c.bf16 %v921_v48, %v921_v48  ;;  %934 = vtanh.f32 %v568_v47  ;;  %v560_v51 = vadd.f32 %v1064_v27, %v559_v49 }
 0x1b6   : > { %v923_v52 = vpop.eup %922  ;;  %v879_v53 = vpop.f32.mrf.mxu1 }
 0x1b7   : > { %671 = vst.msk [vmem:[%s1078_s29] sm:$0xf] %vm670_vm1, %v790_v50  ;;  %v793_v54 = vpack.c.bf16 %v923_v52, %v923_v52  ;;  %936 = vtanh.f32 %v560_v51  ;;  %v571_v55 = vadd.f32 %v879_v53, %v1064_v27 }
 0x1b8   : > { %v925_v56 = vpop.eup %924  ;;  %v562_v57 = vpop.f32.mrf.mxu1 }
 0x1b9   : > { %674 = vst.msk [vmem:[%s1078_s29 + $0xc] sm:$0xf] %vm670_vm1, %v793_v54  ;;  %v791_v58 = vpack.c.bf16 %v925_v56, %v925_v56  ;;  %938 = vtanh.f32 %v571_v55  ;;  %v563_v59 = vadd.f32 %v1064_v27, %v562_v57 }
 0x1ba   : > { %v927_v60 = vpop.eup %926  ;;  %v882_v61 = vpop.f32.mrf.mxu1 }
 0x1bb   : > { %672 = vst.msk [vmem:[%s1078_s29 + $0x4] sm:$0xf] %vm670_vm1, %v791_v58  ;;  %v796_v62 = vpack.c.bf16 %v927_v60, %v927_v60  ;;  %940 = vtanh.f32 %v563_v59  ;;  %v584_v63 = vadd.f32 %v882_v61, %v1064_v27 }
 0x1bc   : > { %v929_v0 = vpop.eup %928  ;;  %v575_v1 = vpop.f32.mrf.mxu1 }
 0x1bd   : > { %677 = vst.msk [vmem:[%s1078_s29 + $0x18] sm:$0xf] %vm670_vm1, %v796_v62  ;;  %v794_v2 = vpack.c.bf16 %v929_v0, %v929_v0  ;;  %942 = vtanh.f32 %v584_v63  ;;  %v576_v3 = vadd.f32 %v1064_v27, %v575_v1 }
 0x1be   : > { %v931_v4 = vpop.eup %930  ;;  %v883_v5 = vpop.f32.mrf.mxu1 }
 0x1bf   : > { %675 = vst.msk [vmem:[%s1078_s29 + $0x10] sm:$0xf] %vm670_vm1, %v794_v2  ;;  %v797_v6 = vpack.c.bf16 %v931_v4, %v931_v4  ;;  %944 = vtanh.f32 %v576_v3  ;;  %v587_v7 = vadd.f32 %v883_v5, %v1064_v27 }
 0x1c0   : > { %v933_v8 = vpop.eup %932  ;;  %v578_v9 = vpop.f32.mrf.mxu1 }
 0x1c1   : > { %678 = vst.msk [vmem:[%s1078_s29 + $0x1c] sm:$0xf] %vm670_vm1, %v797_v6  ;;  %v795_v10 = vpack.c.bf16 %v933_v8, %v933_v8  ;;  %946 = vtanh.f32 %v587_v7  ;;  %v579_v11 = vadd.f32 %v1064_v27, %v578_v9 }
 0x1c2   : > { %v935_v12 = vpop.eup %934 }
 0x1c3   : > { %676 = vst.msk [vmem:[%s1078_s29 + $0x14] sm:$0xf] %vm670_vm1, %v795_v10  ;;  %v800_v13 = vpack.c.bf16 %v935_v12, %v935_v12  ;;  %948 = vtanh.f32 %v579_v11 }
 0x1c4   : > { %v937_v14 = vpop.eup %936 }
 0x1c5   : > { %681 = vst.msk [vmem:[%s1078_s29 + $0x28] sm:$0xf] %vm670_vm1, %v800_v13  ;;  %v798_v15 = vpack.c.bf16 %v937_v14, %v937_v14 }
 0x1c6   : > { %v939_v16 = vpop.eup %938 }
 0x1c7   : > { %679 = vst.msk [vmem:[%s1078_s29 + $0x20] sm:$0xf] %vm670_vm1, %v798_v15  ;;  %v801_v17 = vpack.c.bf16 %v939_v16, %v939_v16 }
 0x1c8   : > { %v941_v18 = vpop.eup %940 }
 0x1c9   : > { %682 = vst.msk [vmem:[%s1078_s29 + $0x2c] sm:$0xf] %vm670_vm1, %v801_v17  ;;  %v799_v19 = vpack.c.bf16 %v941_v18, %v941_v18 }
 0x1ca   : > { %v943_v20 = vpop.eup %942 }
 0x1cb   : > { %680 = vst.msk [vmem:[%s1078_s29 + $0x24] sm:$0xf] %vm670_vm1, %v799_v19  ;;  %v804_v21 = vpack.c.bf16 %v943_v20, %v943_v20 }
 0x1cc   : > { %v945_v22 = vpop.eup %944 }
 0x1cd   : > { %685 = vst.msk [vmem:[%s1078_s29 + $0x38] sm:$0xf] %vm670_vm1, %v804_v21  ;;  %v802_v23 = vpack.c.bf16 %v945_v22, %v945_v22 }
 0x1ce   : > { %v947_v24 = vpop.eup %946 }
 0x1cf   : > { %683 = vst.msk [vmem:[%s1078_s29 + $0x30] sm:$0xf] %vm670_vm1, %v802_v23  ;;  %v805_v25 = vpack.c.bf16 %v947_v24, %v947_v24 }
 0x1d0   : > { %v949_v26 = vpop.eup %948 }
 0x1d1   : > { %686 = vst.msk [vmem:[%s1078_s29 + $0x3c] sm:$0xf] %vm670_vm1, %v805_v25  ;;  %v803_v27 = vpack.c.bf16 %v949_v26, %v949_v26 }
 0x1d3   : > { %684 = vst.msk [vmem:[%s1078_s29 + $0x34] sm:$0xf] %vm670_vm1, %v803_v27 }
 0x1d4 PF: > { %s15_s18 = sadd.s32 1, %s956_s18  }
 0x1d5   : > { %p12_p4 = scmp.ge.s32.totalorder %s15_s18, 4  }
 0x1d7   :  { %14 = sbr.rel (!%p12_p4) target bundleno = 1 (0x1), region = 70 }

</bundles_post_ra>
